<compile_context>
chip_gen: v7x
topology: tpu7x:2x2x1
jax: 0.10.0
libtpu: 0.0.40
codegen_flags: <defaults>
</compile_context>

<pallas_src>
import functools

import jax
import jax.numpy as jnp
from jax.experimental import pallas as pl
from jax.experimental.pallas import tpu as pltpu


def _channel_attention_kernel(x_ref, w1t_ref, w2t_ref, o_ref):
    """One grid step == Nb batch elements.

    x_ref:   (Nb, C, HW) VMEM   (channels on sublanes, HW on lanes)
    w1t_ref: (C, Cr)            == Linear(C, Cr, bias=False).weight.T
    w2t_ref: (Cr, C)            == Linear(Cr, C, bias=False).weight.T
    o_ref:   (Nb, C, HW)
    """
    nb = x_ref.shape[0]
    hw = x_ref.shape[-1]

    # --- Pooling: lane reductions over HW (f32 accumulation) -----------------
    xf = x_ref[...].astype(jnp.float32)                   # (Nb, C, HW)
    avg = jnp.sum(xf, axis=-1) * (1.0 / hw)               # (Nb, C)
    mx = jnp.max(xf, axis=-1)                             # (Nb, C)

    # --- Shared MLP, fused across {avg, max} x Nb images ----------------------
    v = jnp.concatenate([avg, mx], axis=0)                # (2*Nb, C)
    h = jnp.maximum(
        jnp.dot(v, w1t_ref[...], preferred_element_type=jnp.float32), 0.0)   # (2*Nb, Cr)
    y = jnp.dot(h, w2t_ref[...], preferred_element_type=jnp.float32)         # (2*Nb, C)
    attn = jax.nn.sigmoid(y[:nb] + y[nb:])                # (Nb, C)

    # --- Channel-wise rescale: re-read x from VMEM (keeps vreg pressure flat),
    #     (Nb, C, 1) broadcasts along the lane (HW) axis; lane-dense store.
    o_ref[...] = (x_ref[...].astype(jnp.float32) * attn[:, :, None]).astype(o_ref.dtype)


def _pick_batch_block(n, c, hw, itemsize, budget_bytes):
    """Largest divisor Nb of n whose (Nb, C, HW) block fits the byte budget."""
    per_image = c * hw * itemsize
    nb = 1
    for cand in range(1, n + 1):
        if n % cand == 0 and cand * per_image <= budget_bytes:
            nb = cand
    return nb


def channel_attention(x_nchw, params, *, block_bytes=4 << 20):
    """Pallas ChannelAttention forward. Input/output are NCHW."""
    N, C, H, W = x_nchw.shape
    HW = H * W
    Cr = params["w1"].shape[0]

    # Contiguous minor-dim merge only (no transpose): NCHW -> (N, C, HW).
    x = x_nchw.reshape(N, C, HW)

    # Tiny one-time weight transposes so the kernel matmuls are plain row-major.
    w1t = params["w1"].T                                   # (C, Cr)
    w2t = params["w2"].T                                   # (Cr, C)

    nb = _pick_batch_block(N, C, HW, x.dtype.itemsize, block_bytes)

    grid_spec = pltpu.PrefetchScalarGridSpec(
        num_scalar_prefetch=0,
        grid=(N // nb,),
        in_specs=[
            pl.BlockSpec((nb, C, HW), lambda i: (i, 0, 0)),   # x (streamed)
            pl.BlockSpec((C, Cr), lambda i: (0, 0)),          # w1.T (resident)
            pl.BlockSpec((Cr, C), lambda i: (0, 0)),          # w2.T (resident)
        ],
        out_specs=pl.BlockSpec((nb, C, HW), lambda i: (i, 0, 0)),
    )

    out = pl.pallas_call(
        _channel_attention_kernel,
        out_shape=jax.ShapeDtypeStruct((N, C, HW), x.dtype),
        grid_spec=grid_spec,
        compiler_params=pltpu.CompilerParams(
            dimension_semantics=("parallel",)),
    )(x, w1t, w2t)

    return out.reshape(N, C, H, W)


def make_params(key, channels, reduction=16):
    """Weights in PyTorch orientation: Linear(in, out, bias=False).weight is (out, in)."""
    cr = max(channels // reduction, 1)
    k1, k2 = jax.random.split(key)
    w1 = jax.random.normal(k1, (cr, channels), jnp.float32) / jnp.sqrt(channels)
    w2 = jax.random.normal(k2, (channels, cr), jnp.float32) / jnp.sqrt(cr)
    return dict(w1=w1, w2=w2)


def _reference(x, p):
    """Pure-JAX mirror of the PyTorch ChannelAttention.forward."""
    avg = jnp.mean(x, axis=(2, 3))                    # (N, C)
    mx = jnp.max(x, axis=(2, 3))                      # (N, C)

    def mlp(v):
        return jnp.maximum(v @ p["w1"].T, 0.0) @ p["w2"].T

    attn = jax.nn.sigmoid(mlp(avg) + mlp(mx))         # (N, C)
    return x * attn[:, :, None, None]


if __name__ == "__main__":
    reduction = 16
    key = jax.random.PRNGKey(0)
    k_x, k_p, k_x2 = jax.random.split(key, 3)

    # Small demo shape (module default reduction=16 -> hidden = 2).
    N, C, H, W = 2, 32, 16, 16
    x = jax.random.normal(k_x, (N, C, H, W), jnp.float32)
    params = make_params(k_p, C, reduction)

    run = jax.jit(functools.partial(channel_attention))
    out = run(x, params)
    jax.block_until_ready(out)

    ref = _reference(x, params)
    assert out.shape == (N, C, H, W)
    assert jnp.allclose(out, ref, atol=1e-5, rtol=1e-5)

    # Second check: larger batch with a tight block budget to force a
    # multi-step grid (Nb < N) and exercise the batched index maps.
    N2 = 8
    x2 = jax.random.normal(k_x2, (N2, C, H, W), jnp.float32)
    run2 = jax.jit(functools.partial(channel_attention, block_bytes=64 << 10))
    out2 = run2(x2, params)
    jax.block_until_ready(out2)
    assert jnp.allclose(out2, _reference(x2, params), atol=1e-5, rtol=1e-5)

    print("KERNEL_OK")
</pallas_src>

<mosaic_0001>
module attributes {stable_mosaic.version = 11 : i64} {
  func.func @_channel_attention_kernel(%arg0: i32, %arg1: memref<2x32x256xf32, #tpu.memory_space<vmem>>, %arg2: memref<32x2xf32, #tpu.memory_space<vmem>>, %arg3: memref<2x32xf32, #tpu.memory_space<vmem>>, %arg4: memref<2x32x256xf32, #tpu.memory_space<vmem>>) attributes {dimension_semantics = [#tpu.dimension_semantics<parallel>], iteration_bounds = array<i64: 1>, scalar_prefetch = 0 : i64, scratch_operands = 0 : i64, tpu.core_type = #tpu.core_type<tc>, window_params = [{transform_indices = @transform_0, window_bounds = array<i64: 2, 32, 256>}, {pipeline_mode = #tpu.pipeline_mode<synchronous>, transform_indices = @transform_1, window_bounds = array<i64: 32, 2>}, {pipeline_mode = #tpu.pipeline_mode<synchronous>, transform_indices = @transform_2, window_bounds = array<i64: 2, 32>}, {transform_indices = @transform_3, window_bounds = array<i64: 2, 32, 256>}]} {
    %c0 = arith.constant 0 : index
    %c0_0 = arith.constant 0 : index
    %c0_1 = arith.constant 0 : index
    %0 = vector.load %arg1[%c0, %c0_0, %c0_1] : memref<2x32x256xf32, #tpu.memory_space<vmem>>, vector<2x32x256xf32>
    %cst = arith.constant dense<0.000000e+00> : vector<2x32xf32>
    %1 = vector.multi_reduction <add>, %0, %cst [2] : vector<2x32x256xf32> to vector<2x32xf32>
    %cst_2 = arith.constant 3.906250e-03 : f32
    %2 = vector.broadcast %cst_2 : f32 to vector<2x32xf32>
    %3 = arith.mulf %1, %2 : vector<2x32xf32>
    %cst_3 = arith.constant dense<0xFF800000> : vector<2x32xf32>
    %4 = vector.multi_reduction <maximumf>, %0, %cst_3 [2] : vector<2x32x256xf32> to vector<2x32xf32>
    %5 = tpu.concatenate %3, %4 in 0 : vector<2x32xf32>, vector<2x32xf32> -> vector<4x32xf32>
    %c0_4 = arith.constant 0 : index
    %c0_5 = arith.constant 0 : index
    %6 = vector.load %arg2[%c0_4, %c0_5] : memref<32x2xf32, #tpu.memory_space<vmem>>, vector<32x2xf32>
    %cst_6 = arith.constant dense<0.000000e+00> : vector<4x2xf32>
    %7 = tpu.matmul %5, %6, %cst_6 {dimension_numbers = #tpu.dot_dimension_numbers<[1], [0], [0], [1], [0, 0, 1, 1], [], []>} : vector<4x32xf32>, vector<32x2xf32>, vector<4x2xf32> -> vector<4x2xf32>
    %cst_7 = arith.constant 0.000000e+00 : f32
    %8 = vector.broadcast %cst_7 : f32 to vector<4x2xf32>
    %9 = arith.maximumf %7, %8 : vector<4x2xf32>
    %c0_8 = arith.constant 0 : index
    %c0_9 = arith.constant 0 : index
    %10 = vector.load %arg3[%c0_8, %c0_9] : memref<2x32xf32, #tpu.memory_space<vmem>>, vector<2x32xf32>
    %cst_10 = arith.constant dense<0.000000e+00> : vector<4x32xf32>
    %11 = tpu.matmul %9, %10, %cst_10 {dimension_numbers = #tpu.dot_dimension_numbers<[1], [0], [0], [1], [0, 0, 1, 1], [], []>} : vector<4x2xf32>, vector<2x32xf32>, vector<4x32xf32> -> vector<4x32xf32>
    %12 = vector.extract_strided_slice %11 {offsets = [0, 0], sizes = [2, 32], strides = [1, 1]} : vector<4x32xf32> to vector<2x32xf32>
    %13 = vector.extract_strided_slice %11 {offsets = [2, 0], sizes = [2, 32], strides = [1, 1]} : vector<4x32xf32> to vector<2x32xf32>
    %14 = arith.addf %12, %13 : vector<2x32xf32>
    %15 = arith.negf %14 : vector<2x32xf32>
    %16 = math.exp %15 : vector<2x32xf32>
    %cst_11 = arith.constant 1.000000e+00 : f32
    %17 = vector.broadcast %cst_11 : f32 to vector<2x32xf32>
    %18 = arith.addf %17, %16 : vector<2x32xf32>
    %19 = arith.divf %17, %18 : vector<2x32xf32>
    %c0_12 = arith.constant 0 : index
    %c0_13 = arith.constant 0 : index
    %c0_14 = arith.constant 0 : index
    %20 = vector.load %arg1[%c0_12, %c0_13, %c0_14] : memref<2x32x256xf32, #tpu.memory_space<vmem>>, vector<2x32x256xf32>
    %21 = vector.shape_cast %19 : vector<2x32xf32> to vector<2x32x1xf32>
    %22 = vector.broadcast %21 : vector<2x32x1xf32> to vector<2x32x256xf32>
    %23 = arith.mulf %20, %22 : vector<2x32x256xf32>
    %c0_15 = arith.constant 0 : index
    %c0_16 = arith.constant 0 : index
    %c0_17 = arith.constant 0 : index
    %24 = vector.load %arg4[%c0_15, %c0_16, %c0_17] : memref<2x32x256xf32, #tpu.memory_space<vmem>>, vector<2x32x256xf32>
    tpu.vector_store %arg4[%c0_15, %c0_16, %c0_17], %23 {strides = array<i32>} : memref<2x32x256xf32, #tpu.memory_space<vmem>>, vector<2x32x256xf32>,
    return
  }
  func.func @transform_0(%arg0: i32) -> (i32, i32, i32) {
    %c0_i32 = arith.constant 0 : i32
    %c0_i32_0 = arith.constant 0 : i32
    %c0_i32_1 = arith.constant 0 : i32
    return %arg0, %c0_i32, %c0_i32_0 : i32, i32, i32
  }
  func.func @transform_1(%arg0: i32) -> (i32, i32) {
    %c0_i32 = arith.constant 0 : i32
    %c0_i32_0 = arith.constant 0 : i32
    %c0_i32_1 = arith.constant 0 : i32
    return %c0_i32, %c0_i32_0 : i32, i32
  }
  func.func @transform_2(%arg0: i32) -> (i32, i32) {
    %c0_i32 = arith.constant 0 : i32
    %c0_i32_0 = arith.constant 0 : i32
    %c0_i32_1 = arith.constant 0 : i32
    return %c0_i32, %c0_i32_0 : i32, i32
  }
  func.func @transform_3(%arg0: i32) -> (i32, i32, i32) {
    %c0_i32 = arith.constant 0 : i32
    %c0_i32_0 = arith.constant 0 : i32
    %c0_i32_1 = arith.constant 0 : i32
    return %arg0, %c0_i32, %c0_i32_0 : i32, i32, i32
  }
}

</mosaic_0001>

<bundles_post_ra>
// kernel: channel_attention.1
= control target key start
LH: loop header
LB: loop body
LE: loop exit
PB: predicated region body
PF: predicated region fallthrough
CT: control target
= control target key end

     0   :  { %v475_v35 = vmov 0.0|0.0   ;;  %vm476_vm0 = vmmov 0   ;;  %v477_v39 = vmov 0.0   ;;  %v94_v45 = vlaneseq  ;;  %s711_s0 = inlined_call_operand.vmem [shape: f32[2,32,256], index: 0, kind: input, shape index: {}]   ;;  %s712_s1 = inlined_call_operand.vmem [shape: f32[32,2], index: 1, kind: input, shape index: {}]   ;;  %s713_s2 = inlined_call_operand.vmem [shape: f32[2,32], index: 2, kind: input, shape index: {}]   ;;  %s714_s3 = inlined_call_operand.vmem [shape: f32[2,32,256], index: 3, kind: output, shape index: {}]  }
   0x1   :  { %v501_v0 = vld [vmem:[%s711_s0 + $0x40] sm:$0xff]  ;;  %v506_v1 = vld [vmem:[%s711_s0 + $0x48] sm:$0xff]  ;;  %v523_v5 = vld [vmem:[%s711_s0 + $0x50] sm:$0xff]  ;;  %462 = vmatprep.subr.bf16.mxu0 %v475_v35  ;;  %454 = vmatprep.mubr.msk.f32.mxu0 %vm476_vm0, %v477_v39  ;;  %vm105_vm1 = vcmask 130112   ;;  %vm112_vm2 = vcmask 195712   ;;  %vm119_vm3 = vcmask 261312  }
   0x2   :  { %v511_v2 = vld [vmem:[%s711_s0] sm:$0xff]  ;;  %v42_v3 = vadd.f32 %v506_v1, %v501_v0  ;;  %v518_v4 = vld [vmem:[%s711_s0 + $0x8] sm:$0xff]  ;;  %v528_v6 = vld [vmem:[%s711_s0 + $0x58] sm:$0xff]  ;;  %v74_v27 = vmax.f32 %v501_v0, %v506_v1  ;;  %457 = vmatprep.subr.mxu1 %v477_v39  ;;  %459 = vmatprep.mubr.msk.f32.mxu1 %vm476_vm0, %v477_v39  ;;  %v95_v48 = vand.u32 127, %v94_v45  ;;  %v622_v50 = vshrl.u32 %v94_v45, 7 }
   0x3   :  { %v30_v7 = vadd.f32 %v518_v4, %v511_v2  ;;  %v535_v8 = vld [vmem:[%s711_s0 + $0x10] sm:$0xff]  ;;  %v540_v9 = vld [vmem:[%s711_s0 + $0x18] sm:$0xff]  ;;  %v45_v10 = vadd.f32 %v528_v6, %v523_v5  ;;  %v549_v12 = vld [vmem:[%s711_s0 + $0x60] sm:$0xff]  ;;  %v62_v25 = vmax.f32 %v511_v2, %v518_v4  ;;  %v77_v26 = vmax.f32 %v523_v5, %v528_v6 }
   0x4   :  { %43 = vadd.xlane.f32.xlu1 %v42_v3  ;;  %v33_v11 = vadd.f32 %v540_v9, %v535_v8  ;;  %v554_v13 = vld [vmem:[%s711_s0 + $0x68] sm:$0xff]  ;;  %v559_v14 = vld [vmem:[%s711_s0 + $0x20] sm:$0xff]  ;;  %v573_v18 = vld [vmem:[%s711_s0 + $0x70] sm:$0xff]  ;;  %v65_v24 = vmax.f32 %v535_v8, %v540_v9  ;;  %v100_v51 = vadd.s32 4294967288, %v95_v48  ;;  %v107_v52 = vadd.s32 4294967280, %v95_v48 }
   0x5   :  { %31 = vadd.xlane.f32.xlu0 %v30_v7  ;;  %v564_v15 = vld [vmem:[%s711_s0 + $0x28] sm:$0xff]  ;;  %v48_v16 = vadd.f32 %v554_v13, %v549_v12  ;;  %v578_v19 = vld [vmem:[%s711_s0 + $0x78] sm:$0xff]  ;;  %v583_v20 = vld [vmem:[%s711_s0 + $0x30] sm:$0xff]  ;;  %v80_v28 = vmax.f32 %v549_v12, %v554_v13  ;;  %v114_v54 = vadd.s32 4294967272, %v95_v48  ;;  %v98_v56 = vsub.s32 %v95_v48, %v622_v50 }
   0x6   :  { %v36_v17 = vadd.f32 %v564_v15, %v559_v14  ;;  %v588_v21 = vld [vmem:[%s711_s0 + $0x38] sm:$0xff]  ;;  %v51_v22 = vadd.f32 %v578_v19, %v573_v18  ;;  %v68_v29 = vmax.f32 %v559_v14, %v564_v15  ;;  %v83_v30 = vmax.f32 %v573_v18, %v578_v19  ;;  %v194_v32 = vld [vmem:[%s712_s1] sm:$0xff]  ;;  %v195_v33 = vld [vmem:[%s712_s1 + $0x8] sm:$0xff] }
   0x7   :  { %v39_v23 = vadd.f32 %v588_v21, %v583_v20  ;;  %v71_v31 = vmax.f32 %v583_v20, %v588_v21  ;;  %v463_v34 = vpack.c.bf16 %v195_v33, %v194_v32  ;;  %v196_v36 = vld [vmem:[%s712_s1 + $0x10] sm:$0xff]  ;;  %v197_v37 = vld [vmem:[%s712_s1 + $0x18] sm:$0xff]  ;;  %v103_v57 = vsub.s32 %v100_v51, %v622_v50 }
   0x8   :  { %46 = vadd.xlane.f32.xlu1 %v45_v10  ;;  %v466_v38 = vpack.c.bf16 %v197_v37, %v196_v36  ;;  %v110_v59 = vsub.s32 %v107_v52, %v622_v50  ;;  %v117_v10 = vsub.s32 %v114_v54, %v622_v50  ;;  %vm140_vm4 = vcmask 1041409  }
   0x9   :  { %34 = vadd.xlane.f32.xlu0 %v33_v11  ;;  %464 = vmatpush3.bf16.msra.mxu0 %v463_v34  ;;  %vm189_vm5 = vcmask 1043459   ;;  %vm192_vm6 = vcmask 1041408   ;;  %vm198_vm7 = vcmask 261120   ;;  %vm274_vm8 = vcmask 15360  }
   0xa   :  { %465 = vmatprep.subr.bf16.mxu0 %v475_v35 }
   0xc   :  { %49 = vadd.xlane.f32.xlu1 %v48_v16 }
   0xd   :  { %37 = vadd.xlane.f32.xlu0 %v36_v17  ;;  %467 = vmatpush3.bf16.msra.mxu0 %v466_v38 }
  0x10   :  { %52 = vadd.xlane.f32.xlu1 %v51_v22 }
  0x11   :  { %40 = vadd.xlane.f32.xlu0 %v39_v23 }
  0x14   :  { %66 = vmax.xlane.f32.xlu1 %v65_v24 }
  0x15   :  { %63 = vmax.xlane.f32.xlu0 %v62_v25 }
  0x18   :  { %78 = vmax.xlane.f32.xlu1 %v77_v26 }
  0x19   :  { %75 = vmax.xlane.f32.xlu0 %v74_v27 }
  0x1c   :  { %81 = vmax.xlane.f32.xlu1 %v80_v28 }
  0x1d   :  { %69 = vmax.xlane.f32.xlu0 %v68_v29 }
  0x20   :  { %84 = vmax.xlane.f32.xlu1 %v83_v30 }
  0x21   :  { %72 = vmax.xlane.f32.xlu0 %v71_v31 }
  0x91   :  { %v44_v40 = vpop.xlane.xlu1 %43 }
  0x92   :  { %v32_v41 = vpop.xlane.xlu0 %31  ;;  %v58_v60 = vmul.f32 0.00390625, %v44_v40 }
  0x93   :  { %v54_v61 = vmul.f32 0.00390625, %v32_v41 }
  0x94   :  { %v124_v23 = vrot.slane %v58_v60, %v98_v56 }
  0x95   :  { %v47_v42 = vpop.xlane.xlu1 %46  ;;  %v99_v24 = vrot.slane %v54_v61, %v98_v56 }
  0x96   :  { %v35_v43 = vpop.xlane.xlu0 %34  ;;  %v59_v58 = vmul.f32 0.00390625, %v47_v42 }
  0x97   :  { %v55_v62 = vmul.f32 0.00390625, %v35_v43 }
  0x98   :  { %v128_v22 = vrot.slane %v59_v58, %v103_v57  ;;  %v273_v58 = vld [vmem:[%s713_s2] sm:$0x3] }
  0x99   :  { %v50_v44 = vpop.xlane.xlu1 %49  ;;  %v104_v25 = vrot.slane %v55_v62, %v103_v57  ;;  %458 = vmatpush3.msk.msra.mxu1 %vm192_vm6, %v273_v58 }
  0x9a   :  { %v38_v46 = vpop.xlane.xlu0 %37  ;;  %v60_v63 = vmul.f32 0.00390625, %v50_v44  ;;  %v129_v37 = vsel %vm105_vm1, %v128_v22, %v124_v23 }
  0x9b   :  { %v56_v7 = vmul.f32 0.00390625, %v38_v46  ;;  %v106_v39 = vsel %vm105_vm1, %v104_v25, %v99_v24  ;;  %v382_v24 = vsub.s32 1, %v622_v50 }
  0x9c   :  { %v133_v26 = vrot.slane %v60_v63, %v110_v59 }
  0x9d   :  { %v53_v47 = vpop.xlane.xlu1 %52  ;;  %v111_v28 = vrot.slane %v56_v7, %v110_v59 }
  0x9e   :  { %v41_v49 = vpop.xlane.xlu0 %40  ;;  %v61_v11 = vmul.f32 0.00390625, %v53_v47  ;;  %v134_v40 = vsel %vm112_vm2, %v133_v26, %v129_v37 }
  0x9f   :  { %v57_v17 = vmul.f32 0.00390625, %v41_v49  ;;  %v113_v42 = vsel %vm112_vm2, %v111_v28, %v106_v39 }
  0xa0   :  { %v138_v29 = vrot.slane %v61_v11, %v117_v10 }
  0xa1   :  { %v67_v53 = vpop.xlane.xlu1 %66  ;;  %v118_v33 = vrot.slane %v57_v17, %v117_v10  ;;  %v363_v17 = vsub.s32 0, %v622_v50 }
  0xa2   :  { %v64_v55 = vpop.xlane.xlu0 %63  ;;  %v158_v34 = vrot.slane %v67_v53, %v103_v57  ;;  %v139_v43 = vsel %vm119_vm3, %v138_v29, %v134_v40 }
  0xa3   :  { %v154_v35 = vrot.slane %v64_v55, %v98_v56  ;;  %v120_v47 = vsel %vm119_vm3, %v118_v33, %v113_v42 }
  0xa4   :  { %v141_v55 = vsel %vm140_vm4, %v139_v43, %v120_v47 }
  0xa5   :  { %v79_v3 = vpop.xlane.xlu1 %78  ;;  %v159_v48 = vsel %vm105_vm1, %v158_v34, %v154_v35 }
  0xa6   :  { %v76_v16 = vpop.xlane.xlu0 %75  ;;  %v177_v30 = vrot.slane %v79_v3, %v103_v57 }
  0xa7   :  { %v173_v31 = vrot.slane %v76_v16, %v98_v56 }
  0xa9   :  { %v82_v27 = vpop.xlane.xlu1 %81  ;;  %v178_v44 = vsel %vm105_vm1, %v177_v30, %v173_v31 }
  0xaa   :  { %v70_v32 = vpop.xlane.xlu0 %69  ;;  %v182_v36 = vrot.slane %v82_v27, %v110_v59 }
  0xab   :  { %v163_v38 = vrot.slane %v70_v32, %v110_v59 }
  0xac   :  { %v183_v49 = vsel %vm112_vm2, %v182_v36, %v178_v44 }
  0xad   :  { %v85_v41 = vpop.xlane.xlu1 %84  ;;  %v164_v52 = vsel %vm112_vm2, %v163_v38, %v159_v48 }
  0xae   :  { %v187_v45 = vrot.slane %v85_v41, %v117_v10  ;;  %v73_v46 = vpop.xlane.xlu0 %72 }
  0xaf   :  { %v168_v51 = vrot.slane %v73_v46, %v117_v10 }
  0xb0   :  { %v188_v53 = vsel %vm119_vm3, %v187_v45, %v183_v49 }
  0xb1   :  { %v169_v54 = vsel %vm119_vm3, %v168_v51, %v164_v52 }
  0xb2   :  { %v190_v56 = vsel %vm189_vm5, %v188_v53, %v169_v54 }
  0xb3   :  { %v193_v57 = vsel %vm192_vm6, %v141_v55, %v190_v56 }
  0xb4   :  { %455 = vmatmul.mubr.msk.f32.vlgmr.msra.gmra.mrb[0].mxu0 %vm198_vm7, %v193_v57 }
 0x187   :  { %v268_v59 = vpop.f32.mrb[0].mxu0 }
 0x188   :  { %v272_v60 = vmax.f32 %v268_v59, 0.0  ;;  %v456_v61 = vpop.f32.mrb[1].mxu0 }
 0x18a   :  { %460 = vmatmul.mubr.msk.f32.vlgmr.msra.gmra.mrb[0].mxu1 %vm274_vm8, %v272_v60 }
 0x25d   :  { %v347_v62 = vpop.f32.mrb[0].mxu1 }
 0x25e   :  { %v352_v63 = vrot.slane %v347_v62, 2  ;;  %v461_v3 = vpop.f32.mrb[1].mxu1 }
 0x260   :  { %v354_v7 = vadd.f32 %v352_v63, %v347_v62 }
 0x262   :  { %v438_v10 = vmul.f32 -1.442695, %v354_v7 }
 0x264   :  { %471 = vpow2.f32 %v438_v10 }
 0x26e   :  { %v472_v11 = vpop.eup %471 }
 0x26f   :  { %v358_v16 = vadd.f32 1.0, %v472_v11 }
 0x271   :  { %473 = vrcp.f32 %v358_v16 }
 0x27b   :  { %v474_v22 = vpop.eup %473 }
 0x27c   :  { %v364_v23 = vrot.slane %v474_v22, %v363_v17  ;;  %v383_v25 = vrot.slane %v474_v22, %v382_v24 }
 0x27e   :  { %370 = vbcast.lane.b32.xlu1 %v364_v23, 264  ;;  %366 = vbcast.lane.b32.xlu0 %v364_v23, 256 }
 0x282   :  { %374 = vbcast.lane.b32.xlu1 %v364_v23, 272  ;;  %385 = vbcast.lane.b32.xlu0 %v383_v25, 256 }
 0x286   :  { %378 = vbcast.lane.b32.xlu1 %v364_v23, 280  ;;  %393 = vbcast.lane.b32.xlu0 %v383_v25, 272 }
 0x28a   :  { %389 = vbcast.lane.b32.xlu1 %v383_v25, 264 }
 0x28e   :  { %397 = vbcast.lane.b32.xlu1 %v383_v25, 280 }
 0x2f0   :  { %v371_v26 = vpop.permute.xlu1 %370  ;;  %v367_v27 = vpop.permute.xlu0 %366 }
 0x2f1   :  { %v401_v28 = vmul.f32 %v371_v26, %v535_v8  ;;  %v402_v29 = vmul.f32 %v371_v26, %v540_v9  ;;  %v399_v30 = vmul.f32 %v367_v27, %v511_v2  ;;  %v400_v31 = vmul.f32 %v367_v27, %v518_v4 }
 0x2f3   :  { %417 = vst [vmem:[%s714_s3 + $0x10] sm:$0xff] %v401_v28  ;;  %418 = vst [vmem:[%s714_s3 + $0x18] sm:$0xff] %v402_v29 }
 0x2f4   :  { %415 = vst [vmem:[%s714_s3] sm:$0xff] %v399_v30  ;;  %416 = vst [vmem:[%s714_s3 + $0x8] sm:$0xff] %v400_v31  ;;  %v375_v8 = vpop.permute.xlu1 %374  ;;  %v386_v2 = vpop.permute.xlu0 %385 }
 0x2f5   :  { %v403_v4 = vmul.f32 %v375_v8, %v559_v14  ;;  %v404_v9 = vmul.f32 %v375_v8, %v564_v15  ;;  %v407_v50 = vmul.f32 %v386_v2, %v501_v0  ;;  %v408_v32 = vmul.f32 %v386_v2, %v506_v1 }
 0x2f7   :  { %419 = vst [vmem:[%s714_s3 + $0x20] sm:$0xff] %v403_v4  ;;  %420 = vst [vmem:[%s714_s3 + $0x28] sm:$0xff] %v404_v9 }
 0x2f8   :  { %423 = vst [vmem:[%s714_s3 + $0x40] sm:$0xff] %v407_v50  ;;  %424 = vst [vmem:[%s714_s3 + $0x48] sm:$0xff] %v408_v32  ;;  %v379_v14 = vpop.permute.xlu1 %378  ;;  %v394_v0 = vpop.permute.xlu0 %393 }
 0x2f9   :  { %v405_v1 = vmul.f32 %v379_v14, %v583_v20  ;;  %v406_v15 = vmul.f32 %v379_v14, %v588_v21  ;;  %v411_v33 = vmul.f32 %v394_v0, %v549_v12  ;;  %v412_v34 = vmul.f32 %v394_v0, %v554_v13 }
 0x2fb   :  { %421 = vst [vmem:[%s714_s3 + $0x30] sm:$0xff] %v405_v1  ;;  %422 = vst [vmem:[%s714_s3 + $0x38] sm:$0xff] %v406_v15 }
 0x2fc   :  { %427 = vst [vmem:[%s714_s3 + $0x60] sm:$0xff] %v411_v33  ;;  %428 = vst [vmem:[%s714_s3 + $0x68] sm:$0xff] %v412_v34  ;;  %v390_v20 = vpop.permute.xlu1 %389 }
 0x2fd   :  { %v409_v12 = vmul.f32 %v390_v20, %v523_v5  ;;  %v410_v13 = vmul.f32 %v390_v20, %v528_v6 }
 0x2ff   :  { %425 = vst [vmem:[%s714_s3 + $0x50] sm:$0xff] %v409_v12  ;;  %426 = vst [vmem:[%s714_s3 + $0x58] sm:$0xff] %v410_v13 }
 0x300   :  { %v398_v21 = vpop.permute.xlu1 %397 }
 0x301   :  { %v413_v35 = vmul.f32 %v398_v21, %v573_v18  ;;  %v414_v36 = vmul.f32 %v398_v21, %v578_v19 }
 0x303   :  { %429 = vst [vmem:[%s714_s3 + $0x70] sm:$0xff] %v413_v35  ;;  %430 = vst [vmem:[%s714_s3 + $0x78] sm:$0xff] %v414_v36 }

</bundles_post_ra>
